<compile_context>
chip_gen: v7x
topology: tpu7x:2x2x1
jax: 0.10.0
libtpu: 0.0.40
codegen_flags: <defaults>
</compile_context>

<pallas_src>
import functools
import math

import jax
import jax.numpy as jnp
from jax.experimental import pallas as pl
from jax.experimental.pallas import tpu as pltpu


# ----------------------------- tile selection -------------------------------

_VMEM_BLOCK_BUDGET = 10 * 1024 * 1024     # double-buffered block bytes per call


def _lanes(c):
    return ((c + 127) // 128) * 128


def _divisors_desc(n):
    return [d for d in range(n, 0, -1) if n % d == 0]


def _choose_tiles(nbatch, ho, wo, cin, cout, *, n_taps, n_out, out_bytes,
                  force_full_cout=False):
    """Pick (rows-per-band th, out-channel tile tn, #bands nb) under the VMEM budget."""
    if force_full_cout or cout <= 256:
        tn = cout
    elif cout % 256 == 0:
        tn = 256
    elif cout % 128 == 0:
        tn = 128
    else:
        tn = cout

    def fits(th, tn):
        band = (th + 2) * (wo + 2) * _lanes(cin) * 2           # bf16 input band
        wblk = n_taps * cin * _lanes(tn) * 2                   # bf16 weight block
        oblk = n_out * th * wo * _lanes(tn) * out_bytes        # output block(s)
        return 2 * (band + wblk + oblk + 4 * _lanes(tn)) <= _VMEM_BLOCK_BUDGET

    th = None
    while th is None:
        for cand in _divisors_desc(ho):
            if fits(cand, tn):
                th = cand
                break
        if th is None:
            if (not force_full_cout) and tn > 128 and tn % 2 == 0:
                tn //= 2                                       # shrink weight block
            else:
                th = 1                                         # tiny spatial; accept
    nb = ho // th
    # >= 2 blocks on the parallel grid so both v7x TensorCores get work.
    if nbatch * nb * (cout // tn) < 2 and th % 2 == 0:
        th //= 2
        nb = ho // th
    return th, tn, nb


def _make_bands(xp, th, nb):
    """(N, Ho+2, Wp, C) padded input -> (N*nb, th+2, Wp, C) overlapping row bands."""
    n = xp.shape[0]
    if nb == 1:
        return xp
    bands = jnp.stack([xp[:, i * th:i * th + th + 2] for i in range(nb)], axis=1)
    return bands.reshape(n * nb, th + 2, *xp.shape[2:])


# ----------------------------- Pallas kernels -------------------------------

def _conv_kernel(x_ref, w_ref, b_ref, o_ref, *, kh, kw, wo, relu, l2norm):
    """Fused im2col + matmul + bias (+ReLU) (+channel L2 norm) over one row band."""
    cin = x_ref.shape[3]
    tn = o_ref.shape[3]
    th = o_ref.shape[1]
    bias = b_ref[...]                                          # (1, tn) f32

    def row(r, carry):
        acc = jnp.zeros((wo, tn), jnp.float32)
        for a in range(kh):                                    # taps formed in VMEM
            for c in range(kw):
                xr = x_ref[0, pl.ds(r + a, 1), pl.ds(c, wo), :].reshape(wo, cin)
                acc = acc + jnp.dot(xr, w_ref[a * kw + c],
                                    preferred_element_type=jnp.float32)
        out = acc + bias
        if relu:
            out = jnp.maximum(out, 0.0)
        if l2norm:
            # full Cout is in this block (tn == Cout is enforced by the wrapper)
            ss = jnp.sum(out * out, axis=-1, keepdims=True)
            out = out * jax.lax.rsqrt(jnp.maximum(ss, 1e-24))  # == x / max(||x||, 1e-12)
        o_ref[0, pl.ds(r, 1), :, :] = out.reshape(1, wo, tn).astype(o_ref.dtype)
        return carry

    jax.lax.fori_loop(0, th, row, 0)


def _deconv_kernel(x_ref, w_ref, b_ref, o00, o01, o10, o11, *, wo, relu):
    """ConvTranspose2d(4,4,s2,p1) as four sub-pixel 2x2 convs sharing one band."""
    cin = x_ref.shape[3]
    tn = o00.shape[3]
    th = o00.shape[1]
    outs = ((o00, o01), (o10, o11))
    bias = b_ref[...]

    def row(r, carry):
        for dy in range(2):
            for dx in range(2):
                acc = jnp.zeros((wo, tn), jnp.float32)
                for a2 in range(2):
                    for c2 in range(2):
                        tap = ((dy * 2 + dx) * 2 + a2) * 2 + c2
                        xr = x_ref[0, pl.ds(r + dy + a2, 1),
                                   pl.ds(dx + c2, wo), :].reshape(wo, cin)
                        acc = acc + jnp.dot(xr, w_ref[tap],
                                            preferred_element_type=jnp.float32)
                out = acc + bias
                if relu:
                    out = jnp.maximum(out, 0.0)
                outs[dy][dx][0, pl.ds(r, 1), :, :] = (
                    out.reshape(1, wo, tn).astype(o00.dtype))
        return carry

    jax.lax.fori_loop(0, th, row, 0)


# ------------------------------ layer wrappers -------------------------------

def conv2d_3x3(x, w, b, *, relu, l2norm, out_dtype):
    """Stride-1 'same' 3x3 conv, NHWC. w: (9, Cin, Cout) bf16; b: (1, Cout) f32."""
    n, h, wdt, cin = x.shape
    cout = w.shape[-1]
    th, tn, nb = _choose_tiles(n, h, wdt, cin, cout, n_taps=9, n_out=1,
                               out_bytes=jnp.dtype(out_dtype).itemsize,
                               force_full_cout=l2norm)
    xp = jnp.pad(x.astype(jnp.bfloat16), ((0, 0), (1, 1), (1, 1), (0, 0)))
    bands = _make_bands(xp, th, nb)
    nbands = n * nb
    ncout = cout // tn

    out = pl.pallas_call(
        functools.partial(_conv_kernel, kh=3, kw=3, wo=wdt, relu=relu, l2norm=l2norm),
        out_shape=jax.ShapeDtypeStruct((nbands, th, wdt, cout), out_dtype),
        grid_spec=pltpu.PrefetchScalarGridSpec(
            num_scalar_prefetch=0,
            grid=(ncout, nbands),              # j outer: weights streamed exactly once
            in_specs=[
                pl.BlockSpec((1, th + 2, wdt + 2, cin), lambda j, m: (m, 0, 0, 0)),
                pl.BlockSpec((9, cin, tn), lambda j, m: (0, 0, j)),
                pl.BlockSpec((1, tn), lambda j, m: (0, j)),
            ],
            out_specs=pl.BlockSpec((1, th, wdt, tn), lambda j, m: (m, 0, 0, j)),
        ),
        compiler_params=pltpu.CompilerParams(
            dimension_semantics=("parallel", "parallel")),
    )(bands, w, b)
    return out.reshape(n, h, wdt, cout)


def conv_transpose_4x4_s2(x, w, b, *, relu, out_dtype):
    """ConvTranspose2d(k=4, stride=2, pad=1) in ONE pallas_call.
    w: (16, Cin, Cout) bf16 (sub-pixel 2x2 taps); b: (1, Cout) f32."""
    n, h, wdt, cin = x.shape
    cout = w.shape[-1]
    th, tn, nb = _choose_tiles(n, h, wdt, cin, cout, n_taps=16, n_out=4,
                               out_bytes=jnp.dtype(out_dtype).itemsize)
    xp = jnp.pad(x.astype(jnp.bfloat16), ((0, 0), (1, 1), (1, 1), (0, 0)))
    bands = _make_bands(xp, th, nb)
    nbands = n * nb
    ncout = cout // tn

    out_sds = jax.ShapeDtypeStruct((nbands, th, wdt, cout), out_dtype)
    out_spec = pl.BlockSpec((1, th, wdt, tn), lambda j, m: (m, 0, 0, j))
    subs = pl.pallas_call(
        functools.partial(_deconv_kernel, wo=wdt, relu=relu),
        out_shape=(out_sds,) * 4,
        grid_spec=pltpu.PrefetchScalarGridSpec(
            num_scalar_prefetch=0,
            grid=(ncout, nbands),
            in_specs=[
                pl.BlockSpec((1, th + 2, wdt + 2, cin), lambda j, m: (m, 0, 0, 0)),
                pl.BlockSpec((16, cin, tn), lambda j, m: (0, 0, j)),
                pl.BlockSpec((1, tn), lambda j, m: (0, j)),
            ],
            out_specs=(out_spec,) * 4,
        ),
        compiler_params=pltpu.CompilerParams(
            dimension_semantics=("parallel", "parallel")),
    )(bands, w, b)
    o = [s.reshape(n, h, wdt, cout) for s in subs]
    # out[n, 2r+dy, 2q+dx, :] = o[2*dy+dx][n, r, q, :]   (single interleave copy)
    y = jnp.stack([jnp.stack([o[0], o[1]], axis=3),
                   jnp.stack([o[2], o[3]], axis=3)], axis=2)   # (N, H, 2, W, 2, C)
    return y.reshape(n, 2 * h, 2 * wdt, cout)


def maxpool2x2(x):
    # TODO(synk): could be fused into the preceding conv's epilogue.
    n, h, w, c = x.shape
    return x.reshape(n, h // 2, 2, w // 2, 2, c).max(axis=(2, 4))


# ------------------------------ SEGNET params --------------------------------

ENCODER_ARCH = [64, 64, 'M', 128, 128, 'M', 256, 256, 256, 'M',
                512, 512, 512, 'M', 512, 512, 512, 'M', 1024, 1024]

_DECONV_SEL = ((3, 1), (2, 0))      # 4x4 kernel row/col used by (parity, window tap)


def _xavier_normal(key, shape):
    # PyTorch xavier_normal_: std = sqrt(2 / ((fan_in + fan_out)))
    receptive = shape[2] * shape[3]
    std = math.sqrt(2.0 / ((shape[0] + shape[1]) * receptive))
    return std * jax.random.normal(key, shape, dtype=jnp.float32)


def _prep_conv(w_oihw, b):
    """Conv2d weight (O,I,3,3) -> (9, I, O) bf16 (tap index = a*3+c)."""
    o, i, kh, kw = w_oihw.shape
    w = jnp.transpose(w_oihw, (2, 3, 1, 0)).reshape(kh * kw, i, o)
    return {'w': w.astype(jnp.bfloat16), 'b': b.reshape(1, o).astype(jnp.float32)}


def _prep_deconv(w_iohw, b):
    """ConvTranspose2d weight (I,O,4,4) -> (16, I, O) bf16 sub-pixel 2x2 taps."""
    i, o, kh, kw = w_iohw.shape
    assert (kh, kw) == (4, 4)
    w_t = jnp.transpose(w_iohw, (2, 3, 0, 1))                  # (4, 4, I, O)
    taps = []
    for dy in range(2):
        for dx in range(2):
            for a2 in range(2):
                for c2 in range(2):
                    taps.append(w_t[_DECONV_SEL[dy][a2], _DECONV_SEL[dx][c2]])
    w = jnp.stack(taps, axis=0)                                # (16, I, O)
    return {'w': w.astype(jnp.bfloat16), 'b': b.reshape(1, o).astype(jnp.float32)}


def build_segnet(key, in_channels=3, num_units=64):
    """Returns (plan, params): plan = static layer kinds, params = array pytree."""
    decoder_arch = [1024, 'd512', 512, 512, 'D', 'd512', 512, 512, 'D',
                    'd256', 256, 256, 'd128', 128, 128, 'd64', 64, num_units]
    keys = iter(jax.random.split(key, 64))
    plan = {'encoder': [], 'decoder': []}
    params = {'encoder': [], 'decoder': []}

    c = in_channels
    for v in ENCODER_ARCH:
        if v == 'M':
            plan['encoder'].append('pool')
            params['encoder'].append(None)
        else:
            w = _xavier_normal(next(keys), (v, c, 3, 3))       # Conv2d (O,I,3,3)
            plan['encoder'].append('conv')
            params['encoder'].append(_prep_conv(w, jnp.zeros((v,), jnp.float32)))
            c = v

    for v in decoder_arch:
        if v == 'D':
            plan['decoder'].append('dropout')                  # identity in eval
            params['decoder'].append(None)
        elif isinstance(v, str) and v[0] == 'd':
            o = int(v[1:])
            w = _xavier_normal(next(keys), (c, o, 4, 4))       # ConvT (I,O,4,4)
            plan['decoder'].append('deconv')
            params['decoder'].append(_prep_deconv(w, jnp.zeros((o,), jnp.float32)))
            c = o
        elif isinstance(v, str) and v[0] == 'c':
            o = int(v[1:])
            w = _xavier_normal(next(keys), (o, c, 3, 3))
            plan['decoder'].append('conv_nr')                  # conv head, no ReLU
            params['decoder'].append(_prep_conv(w, jnp.zeros((o,), jnp.float32)))
            c = o
        else:                                                  # conv + ReLU
            w = _xavier_normal(next(keys), (v, c, 3, 3))
            plan['decoder'].append('conv')
            params['decoder'].append(_prep_conv(w, jnp.zeros((v,), jnp.float32)))
            c = v
    return plan, params


# ------------------------------- forward pass --------------------------------

def segnet_forward(plan, params, img_nchw, label=None, normalize=True):
    """Eval-mode SEGNET forward (network_name='vgg'). NCHW in -> NCHW features."""
    del label                                                  # only used for training loss
    x = jnp.transpose(img_nchw, (0, 2, 3, 1)).astype(jnp.bfloat16)   # NCHW -> NHWC

    # encoder (self.features)
    for kind, p in zip(plan['encoder'], params['encoder']):
        if kind == 'pool':
            x = maxpool2x2(x)
        else:
            x = conv2d_3x3(x, p['w'], p['b'], relu=True, l2norm=False,
                           out_dtype=jnp.bfloat16)

    # decoder
    n_dec = len(plan['decoder'])
    fused_norm = False
    for idx, (kind, p) in enumerate(zip(plan['decoder'], params['decoder'])):
        if kind == 'dropout':
            continue                                           # nn.Dropout: identity in eval
        is_last = idx == n_dec - 1
        out_dtype = jnp.float32 if is_last else jnp.bfloat16
        if kind == 'deconv':
            x = conv_transpose_4x4_s2(x, p['w'], p['b'], relu=True,
                                      out_dtype=out_dtype)
        else:
            fuse = normalize and is_last
            x = conv2d_3x3(x, p['w'], p['b'], relu=(kind == 'conv'),
                           l2norm=fuse, out_dtype=out_dtype)
            fused_norm = fused_norm or fuse

    if normalize and not fused_norm:
        # Fallback (never hit for this architecture: the head is a conv, and the
        # F.normalize(p=2, dim=1) is fused into its Pallas epilogue above).
        ss = jnp.sum(x.astype(jnp.float32) ** 2, axis=-1, keepdims=True)
        x = x * jax.lax.rsqrt(jnp.maximum(ss, 1e-24))

    return jnp.transpose(x, (0, 3, 1, 2)).astype(jnp.float32)  # NHWC -> NCHW


# ------------------------------ reference checks -----------------------------

def _reference_conv3x3(x_f32, w_oihw, b, relu):
    y = jax.lax.conv_general_dilated(
        x_f32, jnp.transpose(w_oihw, (2, 3, 1, 0)), window_strides=(1, 1),
        padding=((1, 1), (1, 1)), dimension_numbers=('NHWC', 'HWIO', 'NHWC')) + b
    return jnp.maximum(y, 0.0) if relu else y


def _reference_deconv4x4_s2(x_f32, w_iohw, b, relu):
    # ConvTranspose2d(k=4, s=2, p=1) == lhs-dilated conv with the flipped kernel.
    k = jnp.transpose(w_iohw[:, :, ::-1, ::-1], (2, 3, 0, 1))   # (4,4,I,O) HWIO
    y = jax.lax.conv_general_dilated(
        x_f32, k, window_strides=(1, 1), padding=((2, 2), (2, 2)),
        lhs_dilation=(2, 2), dimension_numbers=('NHWC', 'HWIO', 'NHWC')) + b
    return jnp.maximum(y, 0.0) if relu else y


def _rel_err(a, b):
    return float(jnp.max(jnp.abs(a - b)) / (jnp.max(jnp.abs(b)) + 1e-6))


if __name__ == "__main__":
    key = jax.random.PRNGKey(0)
    k_param, k_img, k_t1, k_t2, k_t3, k_t4, k_t5, k_t6 = jax.random.split(key, 8)

    # ---- unit checks: fused conv / deconv kernels vs XLA reference (f32) ----
    xs = 0.5 * jax.random.normal(k_t1, (2, 8, 8, 16), jnp.float32)
    wc = 0.2 * jax.random.normal(k_t2, (32, 16, 3, 3), jnp.float32)    # OIHW
    bc = 0.1 * jax.random.normal(k_t3, (32,), jnp.float32)
    pc = _prep_conv(wc, bc)
    got_c = conv2d_3x3(xs, pc['w'], pc['b'], relu=True, l2norm=False,
                       out_dtype=jnp.float32)
    ref_c = _reference_conv3x3(xs, wc, bc, relu=True)
    assert _rel_err(got_c, ref_c) < 5e-2, f"conv mismatch: {_rel_err(got_c, ref_c)}"

    xd = 0.5 * jax.random.normal(k_t4, (2, 6, 6, 16), jnp.float32)
    wd = 0.2 * jax.random.normal(k_t5, (16, 8, 4, 4), jnp.float32)     # ConvT (I,O,4,4)
    bd = 0.1 * jax.random.normal(k_t6, (8,), jnp.float32)
    pd = _prep_deconv(wd, bd)
    got_d = conv_transpose_4x4_s2(xd, pd['w'], pd['b'], relu=True,
                                  out_dtype=jnp.float32)
    ref_d = _reference_deconv4x4_s2(xd, wd, bd, relu=True)
    assert got_d.shape == ref_d.shape == (2, 12, 12, 8)
    assert _rel_err(got_d, ref_d) < 5e-2, f"deconv mismatch: {_rel_err(got_d, ref_d)}"

    # ------------------------- full SEGNET forward ---------------------------
    plan, params = build_segnet(k_param, in_channels=3, num_units=64)
    # spatial must be a multiple of 32 (5 maxpools / 5 stride-2 deconvs)
    img = jax.random.normal(k_img, (2, 3, 32, 32), dtype=jnp.float32)

    fwd = jax.jit(functools.partial(segnet_forward, plan))
    feats = jax.block_until_ready(fwd(params, img))

    assert feats.shape == (2, 64, 32, 32), feats.shape
    assert bool(jnp.all(jnp.isfinite(feats)))
    print("KERNEL_OK")
</pallas_src>

<mosaic_0001>
module attributes {stable_mosaic.version = 11 : i64} {
  func.func @_conv_kernel(%arg0: i32, %arg1: i32, %arg2: memref<1x10x10x16xbf16, #tpu.memory_space<vmem>>, %arg3: memref<9x16x32xbf16, #tpu.memory_space<vmem>>, %arg4: memref<1x32xf32, #tpu.memory_space<vmem>>, %arg5: memref<1x8x8x32xf32, #tpu.memory_space<vmem>>) attributes {dimension_semantics = [#tpu.dimension_semantics<parallel>, #tpu.dimension_semantics<parallel>], iteration_bounds = array<i64: 1, 2>, scalar_prefetch = 0 : i64, scratch_operands = 0 : i64, tpu.core_type = #tpu.core_type<tc>, window_params = [{transform_indices = @transform_0, window_bounds = array<i64: 1, 10, 10, 16>}, {transform_indices = @transform_1, window_bounds = array<i64: 9, 16, 32>}, {transform_indices = @transform_2, window_bounds = array<i64: 1, 32>}, {transform_indices = @transform_3, window_bounds = array<i64: 1, 8, 8, 32>}]} {
    %c0 = arith.constant 0 : index
    %c0_0 = arith.constant 0 : index
    %0 = vector.load %arg4[%c0, %c0_0] : memref<1x32xf32, #tpu.memory_space<vmem>>, vector<1x32xf32>
    %c0_i32 = arith.constant 0 : i32
    %c8_i32 = arith.constant 8 : i32
    %1 = arith.addi %c0_i32, %c8_i32 : i32
    %c1_i32 = arith.constant 1 : i32
    scf.for %arg6 = %c0_i32 to %1 step %c1_i32  : i32 {
      %cst = arith.constant 0.000000e+00 : f32
      %2 = vector.broadcast %cst : f32 to vector<8x32xf32>
      %c0_i32_2 = arith.constant 0 : i32
      %3 = arith.addi %arg6, %c0_i32_2 : i32
      %c0_3 = arith.constant 0 : index
      %4 = arith.index_cast %3 : i32 to index
      %c0_4 = arith.constant 0 : index
      %c0_5 = arith.constant 0 : index
      %5 = vector.load %arg2[%c0_3, %4, %c0_4, %c0_5] : memref<1x10x10x16xbf16, #tpu.memory_space<vmem>>, vector<1x1x8x16xbf16>
      %6 = vector.shape_cast %5 : vector<1x1x8x16xbf16> to vector<1x8x16xbf16>
      %7 = vector.shape_cast %6 : vector<1x8x16xbf16> to vector<8x16xbf16>
      %c0_6 = arith.constant 0 : index
      %c0_7 = arith.constant 0 : index
      %c0_8 = arith.constant 0 : index
      %8 = vector.load %arg3[%c0_6, %c0_7, %c0_8] : memref<9x16x32xbf16, #tpu.memory_space<vmem>>, vector<1x16x32xbf16>
      %9 = vector.shape_cast %8 : vector<1x16x32xbf16> to vector<16x32xbf16>
      %cst_9 = arith.constant dense<0.000000e+00> : vector<8x32xf32>
      %10 = tpu.matmul %7, %9, %cst_9 {dimension_numbers = #tpu.dot_dimension_numbers<[1], [0], [0], [1], [0, 0, 1, 1], [], []>} : vector<8x16xbf16>, vector<16x32xbf16>, vector<8x32xf32> -> vector<8x32xf32>
      %11 = arith.addf %2, %10 : vector<8x32xf32>
      %c0_i32_10 = arith.constant 0 : i32
      %12 = arith.addi %arg6, %c0_i32_10 : i32
      %c0_11 = arith.constant 0 : index
      %13 = arith.index_cast %12 : i32 to index
      %c1 = arith.constant 1 : index
      %c0_12 = arith.constant 0 : index
      %14 = vector.load %arg2[%c0_11, %13, %c1, %c0_12] : memref<1x10x10x16xbf16, #tpu.memory_space<vmem>>, vector<1x1x8x16xbf16>
      %15 = vector.shape_cast %14 : vector<1x1x8x16xbf16> to vector<1x8x16xbf16>
      %16 = vector.shape_cast %15 : vector<1x8x16xbf16> to vector<8x16xbf16>
      %c1_13 = arith.constant 1 : index
      %c0_14 = arith.constant 0 : index
      %c0_15 = arith.constant 0 : index
      %17 = vector.load %arg3[%c1_13, %c0_14, %c0_15] : memref<9x16x32xbf16, #tpu.memory_space<vmem>>, vector<1x16x32xbf16>
      %18 = vector.shape_cast %17 : vector<1x16x32xbf16> to vector<16x32xbf16>
      %cst_16 = arith.constant dense<0.000000e+00> : vector<8x32xf32>
      %19 = tpu.matmul %16, %18, %cst_16 {dimension_numbers = #tpu.dot_dimension_numbers<[1], [0], [0], [1], [0, 0, 1, 1], [], []>} : vector<8x16xbf16>, vector<16x32xbf16>, vector<8x32xf32> -> vector<8x32xf32>
      %20 = arith.addf %11, %19 : vector<8x32xf32>
      %c0_i32_17 = arith.constant 0 : i32
      %21 = arith.addi %arg6, %c0_i32_17 : i32
      %c0_18 = arith.constant 0 : index
      %22 = arith.index_cast %21 : i32 to index
      %c2 = arith.constant 2 : index
      %c0_19 = arith.constant 0 : index
      %23 = vector.load %arg2[%c0_18, %22, %c2, %c0_19] : memref<1x10x10x16xbf16, #tpu.memory_space<vmem>>, vector<1x1x8x16xbf16>
      %24 = vector.shape_cast %23 : vector<1x1x8x16xbf16> to vector<1x8x16xbf16>
      %25 = vector.shape_cast %24 : vector<1x8x16xbf16> to vector<8x16xbf16>
      %c2_20 = arith.constant 2 : index
      %c0_21 = arith.constant 0 : index
      %c0_22 = arith.constant 0 : index
      %26 = vector.load %arg3[%c2_20, %c0_21, %c0_22] : memref<9x16x32xbf16, #tpu.memory_space<vmem>>, vector<1x16x32xbf16>
      %27 = vector.shape_cast %26 : vector<1x16x32xbf16> to vector<16x32xbf16>
      %cst_23 = arith.constant dense<0.000000e+00> : vector<8x32xf32>
      %28 = tpu.matmul %25, %27, %cst_23 {dimension_numbers = #tpu.dot_dimension_numbers<[1], [0], [0], [1], [0, 0, 1, 1], [], []>} : vector<8x16xbf16>, vector<16x32xbf16>, vector<8x32xf32> -> vector<8x32xf32>
      %29 = arith.addf %20, %28 : vector<8x32xf32>
      %c1_i32_24 = arith.constant 1 : i32
      %30 = arith.addi %arg6, %c1_i32_24 : i32
      %c0_25 = arith.constant 0 : index
      %31 = arith.index_cast %30 : i32 to index
      %c0_26 = arith.constant 0 : index
      %c0_27 = arith.constant 0 : index
      %32 = vector.load %arg2[%c0_25, %31, %c0_26, %c0_27] : memref<1x10x10x16xbf16, #tpu.memory_space<vmem>>, vector<1x1x8x16xbf16>
      %33 = vector.shape_cast %32 : vector<1x1x8x16xbf16> to vector<1x8x16xbf16>
      %34 = vector.shape_cast %33 : vector<1x8x16xbf16> to vector<8x16xbf16>
      %c3 = arith.constant 3 : index
      %c0_28 = arith.constant 0 : index
      %c0_29 = arith.constant 0 : index
      %35 = vector.load %arg3[%c3, %c0_28, %c0_29] : memref<9x16x32xbf16, #tpu.memory_space<vmem>>, vector<1x16x32xbf16>
      %36 = vector.shape_cast %35 : vector<1x16x32xbf16> to vector<16x32xbf16>
      %cst_30 = arith.constant dense<0.000000e+00> : vector<8x32xf32>
      %37 = tpu.matmul %34, %36, %cst_30 {dimension_numbers = #tpu.dot_dimension_numbers<[1], [0], [0], [1], [0, 0, 1, 1], [], []>} : vector<8x16xbf16>, vector<16x32xbf16>, vector<8x32xf32> -> vector<8x32xf32>
      %38 = arith.addf %29, %37 : vector<8x32xf32>
      %c1_i32_31 = arith.constant 1 : i32
      %39 = arith.addi %arg6, %c1_i32_31 : i32
      %c0_32 = arith.constant 0 : index
      %40 = arith.index_cast %39 : i32 to index
      %c1_33 = arith.constant 1 : index
      %c0_34 = arith.constant 0 : index
      %41 = vector.load %arg2[%c0_32, %40, %c1_33, %c0_34] : memref<1x10x10x16xbf16, #tpu.memory_space<vmem>>, vector<1x1x8x16xbf16>
      %42 = vector.shape_cast %41 : vector<1x1x8x16xbf16> to vector<1x8x16xbf16>
      %43 = vector.shape_cast %42 : vector<1x8x16xbf16> to vector<8x16xbf16>
      %c4 = arith.constant 4 : index
      %c0_35 = arith.constant 0 : index
      %c0_36 = arith.constant 0 : index
      %44 = vector.load %arg3[%c4, %c0_35, %c0_36] : memref<9x16x32xbf16, #tpu.memory_space<vmem>>, vector<1x16x32xbf16>
      %45 = vector.shape_cast %44 : vector<1x16x32xbf16> to vector<16x32xbf16>
      %cst_37 = arith.constant dense<0.000000e+00> : vector<8x32xf32>
      %46 = tpu.matmul %43, %45, %cst_37 {dimension_numbers = #tpu.dot_dimension_numbers<[1], [0], [0], [1], [0, 0, 1, 1], [], []>} : vector<8x16xbf16>, vector<16x32xbf16>, vector<8x32xf32> -> vector<8x32xf32>
      %47 = arith.addf %38, %46 : vector<8x32xf32>
      %c1_i32_38 = arith.constant 1 : i32
      %48 = arith.addi %arg6, %c1_i32_38 : i32
      %c0_39 = arith.constant 0 : index
      %49 = arith.index_cast %48 : i32 to index
      %c2_40 = arith.constant 2 : index
      %c0_41 = arith.constant 0 : index
      %50 = vector.load %arg2[%c0_39, %49, %c2_40, %c0_41] : memref<1x10x10x16xbf16, #tpu.memory_space<vmem>>, vector<1x1x8x16xbf16>
      %51 = vector.shape_cast %50 : vector<1x1x8x16xbf16> to vector<1x8x16xbf16>
      %52 = vector.shape_cast %51 : vector<1x8x16xbf16> to vector<8x16xbf16>
      %c5 = arith.constant 5 : index
      %c0_42 = arith.constant 0 : index
      %c0_43 = arith.constant 0 : index
      %53 = vector.load %arg3[%c5, %c0_42, %c0_43] : memref<9x16x32xbf16, #tpu.memory_space<vmem>>, vector<1x16x32xbf16>
      %54 = vector.shape_cast %53 : vector<1x16x32xbf16> to vector<16x32xbf16>
      %cst_44 = arith.constant dense<0.000000e+00> : vector<8x32xf32>
      %55 = tpu.matmul %52, %54, %cst_44 {dimension_numbers = #tpu.dot_dimension_numbers<[1], [0], [0], [1], [0, 0, 1, 1], [], []>} : vector<8x16xbf16>, vector<16x32xbf16>, vector<8x32xf32> -> vector<8x32xf32>
      %56 = arith.addf %47, %55 : vector<8x32xf32>
      %c2_i32 = arith.constant 2 : i32
      %57 = arith.addi %arg6, %c2_i32 : i32
      %c0_45 = arith.constant 0 : index
      %58 = arith.index_cast %57 : i32 to index
      %c0_46 = arith.constant 0 : index
      %c0_47 = arith.constant 0 : index
      %59 = vector.load %arg2[%c0_45, %58, %c0_46, %c0_47] : memref<1x10x10x16xbf16, #tpu.memory_space<vmem>>, vector<1x1x8x16xbf16>
      %60 = vector.shape_cast %59 : vector<1x1x8x16xbf16> to vector<1x8x16xbf16>
      %61 = vector.shape_cast %60 : vector<1x8x16xbf16> to vector<8x16xbf16>
      %c6 = arith.constant 6 : index
      %c0_48 = arith.constant 0 : index
      %c0_49 = arith.constant 0 : index
      %62 = vector.load %arg3[%c6, %c0_48, %c0_49] : memref<9x16x32xbf16, #tpu.memory_space<vmem>>, vector<1x16x32xbf16>
      %63 = vector.shape_cast %62 : vector<1x16x32xbf16> to vector<16x32xbf16>
      %cst_50 = arith.constant dense<0.000000e+00> : vector<8x32xf32>
      %64 = tpu.matmul %61, %63, %cst_50 {dimension_numbers = #tpu.dot_dimension_numbers<[1], [0], [0], [1], [0, 0, 1, 1], [], []>} : vector<8x16xbf16>, vector<16x32xbf16>, vector<8x32xf32> -> vector<8x32xf32>
      %65 = arith.addf %56, %64 : vector<8x32xf32>
      %c2_i32_51 = arith.constant 2 : i32
      %66 = arith.addi %arg6, %c2_i32_51 : i32
      %c0_52 = arith.constant 0 : index
      %67 = arith.index_cast %66 : i32 to index
      %c1_53 = arith.constant 1 : index
      %c0_54 = arith.constant 0 : index
      %68 = vector.load %arg2[%c0_52, %67, %c1_53, %c0_54] : memref<1x10x10x16xbf16, #tpu.memory_space<vmem>>, vector<1x1x8x16xbf16>
      %69 = vector.shape_cast %68 : vector<1x1x8x16xbf16> to vector<1x8x16xbf16>
      %70 = vector.shape_cast %69 : vector<1x8x16xbf16> to vector<8x16xbf16>
      %c7 = arith.constant 7 : index
      %c0_55 = arith.constant 0 : index
      %c0_56 = arith.constant 0 : index
      %71 = vector.load %arg3[%c7, %c0_55, %c0_56] : memref<9x16x32xbf16, #tpu.memory_space<vmem>>, vector<1x16x32xbf16>
      %72 = vector.shape_cast %71 : vector<1x16x32xbf16> to vector<16x32xbf16>
      %cst_57 = arith.constant dense<0.000000e+00> : vector<8x32xf32>
      %73 = tpu.matmul %70, %72, %cst_57 {dimension_numbers = #tpu.dot_dimension_numbers<[1], [0], [0], [1], [0, 0, 1, 1], [], []>} : vector<8x16xbf16>, vector<16x32xbf16>, vector<8x32xf32> -> vector<8x32xf32>
      %74 = arith.addf %65, %73 : vector<8x32xf32>
      %c2_i32_58 = arith.constant 2 : i32
      %75 = arith.addi %arg6, %c2_i32_58 : i32
      %c0_59 = arith.constant 0 : index
      %76 = arith.index_cast %75 : i32 to index
      %c2_60 = arith.constant 2 : index
      %c0_61 = arith.constant 0 : index
      %77 = vector.load %arg2[%c0_59, %76, %c2_60, %c0_61] : memref<1x10x10x16xbf16, #tpu.memory_space<vmem>>, vector<1x1x8x16xbf16>
      %78 = vector.shape_cast %77 : vector<1x1x8x16xbf16> to vector<1x8x16xbf16>
      %79 = vector.shape_cast %78 : vector<1x8x16xbf16> to vector<8x16xbf16>
      %c8 = arith.constant 8 : index
      %c0_62 = arith.constant 0 : index
      %c0_63 = arith.constant 0 : index
      %80 = vector.load %arg3[%c8, %c0_62, %c0_63] : memref<9x16x32xbf16, #tpu.memory_space<vmem>>, vector<1x16x32xbf16>
      %81 = vector.shape_cast %80 : vector<1x16x32xbf16> to vector<16x32xbf16>
      %cst_64 = arith.constant dense<0.000000e+00> : vector<8x32xf32>
      %82 = tpu.matmul %79, %81, %cst_64 {dimension_numbers = #tpu.dot_dimension_numbers<[1], [0], [0], [1], [0, 0, 1, 1], [], []>} : vector<8x16xbf16>, vector<16x32xbf16>, vector<8x32xf32> -> vector<8x32xf32>
      %83 = arith.addf %74, %82 : vector<8x32xf32>
      %84 = vector.broadcast %0 : vector<1x32xf32> to vector<8x32xf32>
      %85 = arith.addf %83, %84 : vector<8x32xf32>
      %cst_65 = arith.constant 0.000000e+00 : f32
      %86 = vector.broadcast %cst_65 : f32 to vector<8x32xf32>
      %87 = arith.maximumf %85, %86 : vector<8x32xf32>
      %88 = vector.shape_cast %87 : vector<8x32xf32> to vector<1x8x32xf32>
      %c0_66 = arith.constant 0 : index
      %89 = arith.index_cast %arg6 : i32 to index
      %c0_67 = arith.constant 0 : index
      %c0_68 = arith.constant 0 : index
      %90 = vector.load %arg5[%c0_66, %89, %c0_67, %c0_68] : memref<1x8x8x32xf32, #tpu.memory_space<vmem>>, vector<1x1x8x32xf32>
      %91 = vector.shape_cast %90 : vector<1x1x8x32xf32> to vector<1x8x32xf32>
      %92 = vector.shape_cast %88 : vector<1x8x32xf32> to vector<1x1x8x32xf32>
      tpu.vector_store %arg5[%c0_66, %89, %c0_67, %c0_68], %92 {strides = array<i32>} : memref<1x8x8x32xf32, #tpu.memory_space<vmem>>, vector<1x1x8x32xf32>,
    }
    %c8_i32_1 = arith.constant 8 : i32
    return
  }
  func.func @transform_0(%arg0: i32, %arg1: i32) -> (i32, i32, i32, i32) {
    %c0_i32 = arith.constant 0 : i32
    %c0_i32_0 = arith.constant 0 : i32
    %c0_i32_1 = arith.constant 0 : i32
    %c0_i32_2 = arith.constant 0 : i32
    return %arg1, %c0_i32, %c0_i32_0, %c0_i32_1 : i32, i32, i32, i32
  }
  func.func @transform_1(%arg0: i32, %arg1: i32) -> (i32, i32, i32) {
    %c0_i32 = arith.constant 0 : i32
    %c0_i32_0 = arith.constant 0 : i32
    %c0_i32_1 = arith.constant 0 : i32
    return %c0_i32, %c0_i32_0, %arg0 : i32, i32, i32
  }
  func.func @transform_2(%arg0: i32, %arg1: i32) -> (i32, i32) {
    %c0_i32 = arith.constant 0 : i32
    %c0_i32_0 = arith.constant 0 : i32
    return %c0_i32, %arg0 : i32, i32
  }
  func.func @transform_3(%arg0: i32, %arg1: i32) -> (i32, i32, i32, i32) {
    %c0_i32 = arith.constant 0 : i32
    %c0_i32_0 = arith.constant 0 : i32
    %c0_i32_1 = arith.constant 0 : i32
    return %arg1, %c0_i32, %c0_i32_0, %arg0 : i32, i32, i32, i32
  }
}

</mosaic_0001>

<bundles_post_ra>
// kernel: tpu_custom_call.1
= control target key start
LH: loop header
LB: loop body
LE: loop exit
PB: predicated region body
PF: predicated region fallthrough
CT: control target
= control target key end

     0   :  { %8 = vsyncpa [#allocation3], 0  ;;  %s1470_s0 = inlined_call_operand.vmem [shape: bf16[2,10,10,16], index: 0, kind: input, shape index: {}]   ;;  %s1471_s1 = inlined_call_operand.vmem [shape: bf16[9,16,32], index: 1, kind: input, shape index: {}]   ;;  %s1472_s2 = inlined_call_operand.vmem [shape: f32[1,32], index: 2, kind: input, shape index: {}]   ;;  %s1473_s3 = inlined_call_operand.hbm [shape: f32[2,8,8,32], index: 3, kind: output, shape index: {}]  }
   0x1   :  { %10 = vsyncpa [#allocation3 + $0x1], 0  ;;  %s1246_s12 = smov 0   ;;  %s1248_s13 = smov 0  }
   0x2   :  { %s1250_s14 = smov 0   ;;  %s1252_s15 = smov 0  }
   0x3   :  { %s1254_s16 = smov 0   ;;  %s1256_s17 = smov 0  }
   0x4 LB: > { %s908_s18 = sadd.s32 4294967295, %s1215_s17   ;;  %s909_s19 = sadd.s32 4294967294, %s1215_s17   ;;  %s1215_s17 = sphi %s1256_s17, %s16_s17   ;;  %s1211_s16 = sphi %s1254_s16, %s1480_s16   ;;  %s1207_s15 = sphi %s1252_s15, %s1479_s15   ;;  %s1203_s14 = sphi %s1250_s14, %s1478_s14   ;;  %s1199_s13 = sphi %s1248_s13, %s1477_s13   ;;  %s1195_s12 = sphi %s1246_s12, %s1476_s12  }
   0x5   : > { %s25_s20 = sadd.s32 1, %s1211_s16  ;;  %s115_s21 = sadd.s32 1, %s1203_s14 }
   0x6   : > { %p26_p0 = scmp.ge.s32.totalorder %s25_s20, 2  ;;  %p125_p1 = scmp.ne.s32.totalorder %s1203_s14, %s1199_s13 }
   0x7   : > { %p126_p2 = scmp.eq.s32.totalorder %s908_s18, 1  ;;  %p131_p3 = scmp.ne.s32.totalorder %s1199_s13, %s1195_s12 }
   0x8   : > { %s1482_s20 = smov (%p26_p0, %s25_s20), 0  ;;  %p132_p5 = scmp.eq.s32.totalorder %s909_s19, 1 }
   0x9   : > { %p1286_p4 = por %p126_p2, %p125_p1  ;;  %s110_s23 = ssub.s32 %s1211_s16, %s1482_s20 }
   0xa   : > { %p914_p6 = scmp.ge.s32.totalorder %s1215_s17, 1  ;;  %p113_p7 = scmp.eq.s32.totalorder %s110_s23, 0 }
   0xb   : > { %p1293_p8 = por %p132_p5, %p131_p3  ;;  %p171_p9 = scmp.lt.s32.totalorder %s1215_s17, 3 }
   0xc   : > { %s1299_s25 = scalar_select %p113_p7, %s1203_s14, %s115_s21  }
   0xd   : > { %p172_p10 = pnand %p914_p6, %p171_p9 }
   0xe   : > { %s199_s26 = sand.u32 (!%p172_p10), 1, %s1199_s13   ;;  %p202_p11 = scmp.lt.s32.totalorder (!%p172_p10), %s1207_s15, 1  ;;  %v1306_v0 = vld [vmem:[%s1472_s2] ss:$0 sm:$0xff] (!%p172_p10) }
   0xf   : > { %175 = sbr.rel (%p172_p10) target bundleno = 303 (0x12f), region = 32  ;;  %s1310_s29 = sshll.u32 (!%p172_p10), %s199_s26, 6 }
  0x10   : > { %s201_s8 = scalar_lea.vmem (!%p172_p10), [#allocation2], %s1310_s29  ;;  %s1319_s9 = smov (!%p172_p10), 0  }
  0x16   : > { %s203_s30 = scalar_select %p202_p11, %s1207_s15, 1 }
  0x18   : > { %s1050_s4 = smul.u32 80, %s203_s30 }
  0x1a   : > { %s1316_s7 = scalar_lea.vmem %s1470_s0, %s1050_s4 }
  0x1b LB: >> { %v1118_v1 = vld [vmem:[%s1471_s1 + $0x8] sm:$0xff]   ;;  %v1221_v2 = vmov 0.0   ;;  %v1119_v3 = vld [vmem:[%s1471_s1] sm:$0xff]   ;;  %vm1222_vm0 = vmmov 0   ;;  %s976_s21 = sshll.u32 %s1219_s9, 3  ;;  %vm250_vm1 = vcmask 130048   ;;  %s1219_s9 = sphi %s1319_s9, %s221_s9  }
  0x1c   : >> { %996 = vmatprep.subr.bf16.mxu0 %v1221_v2  ;;  %1002 = vmatprep.subr.bf16.mxu1 %v1221_v2  ;;  %s1340_s23 = scalar_lea.vmem %s1316_s7, %s976_s21  ;;  %v1122_v6 = vld [vmem:[%s1471_s1 + $0x18] sm:$0xff]   ;;  %v1121_v13 = vld [vmem:[%s1471_s1 + $0x10] sm:$0xff]   ;;  %v1125_v17 = vld [vmem:[%s1471_s1 + $0x28] sm:$0xff]   ;;  %vm777_vm2 = vcmask 261120   ;;  %s221_s9 = sadd.s32 1, %s1219_s9  }
  0x1d   : >> { %997 = vmatpush3.bf16.msra.mxu0 %v1118_v1  ;;  %998 = vmatprep.mubr.msk.bf16.mxu0 %vm1222_vm0, %v1221_v2  ;;  %v225_v4 = vld [vmem:[%s1340_s23] sm:$0xf]  ;;  %v228_v5 = vld [vmem:[%s1340_s23 + $0x4] sm:$0x1]  ;;  %v937_v11 = vld [vmem:[%s1340_s23 + $0x8] sm:$0xf] }
  0x1e   : >> { %1003 = vmatpush3.bf16.msra.mxu1 %v1119_v3  ;;  %1004 = vmatprep.mubr.msk.bf16.mxu1 %vm1222_vm0, %v1221_v2  ;;  %v921_v7 = vcombine.low %v225_v4, %v228_v5  ;;  %v343_v10 = vld [vmem:[%s1340_s23] sm:$0xe]  ;;  %v932_v14 = vld [vmem:[%s1340_s23 + $0x8] sm:$0xf]  ;;  %v938_v15 = vld [vmem:[%s1340_s23 + $0xc] sm:$0x1] }
  0x1f   : >> { %1008 = vmatprep.subr.bf16.mxu0 %v1221_v2  ;;  %1014 = vmatprep.subr.bf16.mxu1 %v1221_v2  ;;  %v944_v18 = vld [vmem:[%s1340_s23 + $0x8] sm:$0xe]  ;;  %v956_v19 = vld [vmem:[%s1340_s23 + $0x10] sm:$0xf]  ;;  %v957_v20 = vld [vmem:[%s1340_s23 + $0x14] sm:$0x1]  ;;  %v928_v21 = vcombine.low %v343_v10, %v228_v5  ;;  %v941_v22 = vcombine.low %v937_v11, %v938_v15 }
  0x20   : >> { %v238_v8 = vshrl.u32 %v921_v7, 16  ;;  %v240_v9 = vshll.u32 %v921_v7, 16  ;;  %v947_v23 = vcombine.low %v944_v18, %v938_v15  ;;  %v960_v24 = vcombine.low %v956_v19, %v957_v20  ;;  %v1124_v27 = vld [vmem:[%s1471_s1 + $0x20] sm:$0xff]   ;;  %v1129_v30 = vld [vmem:[%s1471_s1 + $0x38] sm:$0xff]   ;;  %v1127_v36 = vld [vmem:[%s1471_s1 + $0x30] sm:$0xff]   ;;  %p218_p12 = scmp.ge.s32.totalorder %s221_s9, 8  }
  0x21   : >> { %1005 = vmatmul.mubr.msk.bf16.vlgmr.msra.gmra.mrb[0].mxu1 %vm250_vm1, %v225_v4  ;;  %v350_v25 = vrot.slane %v928_v21, 1  ;;  %v472_v26 = vshll.u32 %v941_v22, 16  ;;  %v470_v31 = vshrl.u32 %v941_v22, 16  ;;  %v951_v38 = vld [vmem:[%s1340_s23 + $0x10] sm:$0xf]  ;;  %v1130_v39 = vld [vmem:[%s1471_s1 + $0x40] sm:$0xff]  }
  0x22   : >> { %1015 = vmatpush3.bf16.msra.mxu1 %v1122_v6  ;;  %1016 = vmatprep.mubr.msk.bf16.mxu1 %vm1222_vm0, %v1221_v2  ;;  %v242_v12 = vrot.slane %v240_v9, 1  ;;  %v533_v28 = vrot.slane %v947_v23, 1  ;;  %v655_v29 = vshll.u32 %v960_v24, 16  ;;  %v653_v33 = vshrl.u32 %v960_v24, 16  ;;  %v963_v40 = vld [vmem:[%s1340_s23 + $0x10] sm:$0xe]  ;;  %s776_s23 = scalar_lea.vmem %s201_s8, %s976_s21 [#allocation2] }
  0x23   : >> { %1026 = vmatprep.subr.bf16.mxu1 %v1221_v2  ;;  %v474_v32 = vrot.slane %v472_v26, 1  ;;  %v966_v41 = vcombine.low %v963_v40, %v957_v20  ;;  %s977_s5 = sshll.u32 (%p218_p12), %s1207_s15, 10  ;;  %s794_s21 = sshll.u32 (%p218_p12), %s201_s8, 4  ;;  %s1420_s21 = int_to_ptr.vmem [resolvable:$true] %s794_s21 }
  0x24   : >> { %v243_v16 = vor.u32 %v242_v12, %v238_v8  ;;  %v657_v34 = vrot.slane %v655_v29, 1  ;;  %s1416_s11 = scalar_lea.hbm (%p218_p12), %s1473_s3, %s977_s5  ;;  %s1424_s9 = scalar_lea.sflag (%p218_p12), [#allocation3], %s199_s26 }
  0x25   : >> { %v475_v35 = vor.u32 %v474_v32, %v470_v31  ;;  %v716_v42 = vrot.slane %v966_v41, 1  ;;  %s1133_s7 = scalar_lea.vmem (%p218_p12), %s1420_s21, 1024  ;;  %s1223_s15 = smov (%p218_p12), [#allocation2]  }
  0x26   : >> { %999 = vmatmul.mubr.msk.bf16.vlgmr.msra.gmra.mrb[0].mxu0 %vm250_vm1, %v243_v16  ;;  %v658_v37 = vor.u32 %v657_v34, %v653_v33  ;;  %p1134_p13 = scmp.ne.s32.totalorder (%p218_p12), %s1420_s21, %s1133_s7  ;;  %s1137_s18 = sshll.u32 (%p218_p12), %s1223_s15, 4  ;;  %s1138_s18 = int_to_ptr.vmem [resolvable:$false] %s1137_s18 }
  0x27   : >> { %1009 = vmatpush3.bf16.msra.mxu0 %v1121_v13  ;;  %1010 = vmatprep.mubr.msk.bf16.mxu0 %vm1222_vm0, %v1221_v2  ;;  %s1139_s19 = scalar_lea.vmem (%p218_p12), %s1138_s18, 2048  ;;  %p1140_p2 = scmp.lt.s32.totalorder (%p218_p12), %s1420_s21, %s1138_s18 }
  0x28   : >> { %1020 = vmatprep.subr.bf16.mxu0 %v1221_v2  ;;  %p1135_p0 = pnand (%p218_p12), %p1134_p13, %p1286_p4  ;;  %p1141_p3 = scmp.lt.s32.totalorder (%p218_p12), %s1139_s19, %s1133_s7 }
  0x29   : >> { %1017 = vmatmul.mubr.msk.bf16.vlgmr.msra.gmra.mrb[4].mxu1 %vm250_vm1, %v932_v14 }
  0x2a   : >> { %1027 = vmatpush3.bf16.msra.mxu1 %v1125_v17  ;;  %1028 = vmatprep.mubr.msk.bf16.mxu1 %vm1222_vm0, %v1221_v2  ;;  %p1136_p1 = pneg (%p218_p12), %p1135_p0  ;;  %p1142_p5 = por (%p218_p12), %p1141_p3, %p1140_p2 }
  0x2b   : >> { %1038 = vmatprep.subr.bf16.mxu1 %v1221_v2 }
  0x2c   : > { %p1143_p6 = pnand (%p218_p12), %p1142_p5, %p1136_p1 }
  0x2e   : >> { %1011 = vmatmul.mubr.msk.bf16.vlgmr.msra.gmra.mrb[4].mxu0 %vm250_vm1, %v350_v25 }
  0x2f   : >> { %1021 = vmatpush3.bf16.msra.mxu0 %v1124_v27  ;;  %1022 = vmatprep.mubr.msk.bf16.mxu0 %vm1222_vm0, %v1221_v2 }
  0x30   : >> { %1032 = vmatprep.subr.bf16.mxu0 %v1221_v2 }
  0x31   : >> { %1029 = vmatmul.mubr.msk.bf16.vlgmr.msra.gmra.mrb[8].mxu1 %vm250_vm1, %v533_v28 }
  0x32   : >> { %1039 = vmatpush3.bf16.msra.mxu1 %v1129_v30  ;;  %1040 = vmatprep.mubr.msk.bf16.mxu1 %vm1222_vm0, %v1221_v2 }
  0x36   : >> { %1023 = vmatmul.mubr.msk.bf16.vlgmr.msra.gmra.mrb[8].mxu0 %vm250_vm1, %v475_v35 }
  0x37   : >> { %1033 = vmatpush3.bf16.msra.mxu0 %v1127_v36  ;;  %1034 = vmatprep.mubr.msk.bf16.mxu0 %vm1222_vm0, %v1221_v2 }
  0x38   : >> { %1044 = vmatprep.subr.bf16.mxu0 %v1221_v2 }
  0x39   : >> { %1041 = vmatmul.mubr.msk.bf16.vlgmr.msra.gmra.mrb[12].mxu1 %vm250_vm1, %v658_v37 }
  0x3e   : >> { %1035 = vmatmul.mubr.msk.bf16.vlgmr.msra.gmra.mrb[12].mxu0 %vm250_vm1, %v951_v38 }
  0x3f   : >> { %1045 = vmatpush3.bf16.msra.mxu0 %v1130_v39  ;;  %1046 = vmatprep.mubr.msk.bf16.mxu0 %vm1222_vm0, %v1221_v2 }
  0x46   : >> { %1047 = vmatmul.mubr.msk.bf16.vlgmr.msra.gmra.mrb[16].mxu0 %vm250_vm1, %v716_v42 }
  0xf4   : >> { %v337_v43 = vpop.f32.mrb[0].mxu1 }
  0xf5   : >> { %v1006_v44 = vpop.f32.mrb[1].mxu1 }
  0xf6   : >> { %v340_v45 = vpop.f32.mrb[2].mxu1 }
  0xf7   : >> { %v1007_v46 = vpop.f32.mrb[3].mxu1 }
  0xf9   : >> { %v288_v47 = vpop.f32.mrb[0].mxu0 }
  0xfa   : >> { %v338_v48 = vadd.f32 %v337_v43, %v288_v47  ;;  %v1000_v49 = vpop.f32.mrb[1].mxu0 }
  0xfb   : >> { %v291_v50 = vpop.f32.mrb[2].mxu0 }
  0xfc   : >> { %v452_v51 = vpop.f32.mrb[4].mxu1  ;;  %v1001_v52 = vpop.f32.mrb[3].mxu0 }
  0xfd   : >> { %v1018_v53 = vpop.f32.mrb[5].mxu1 }
  0xfe   : >> { %v455_v54 = vpop.f32.mrb[6].mxu1 }
  0xff   : >> { %v1019_v55 = vpop.f32.mrb[7].mxu1 }
 0x101   : >> { %v394_v56 = vpop.f32.mrb[4].mxu0 }
 0x102   : >> { %v400_v57 = vadd.f32 %v394_v56, %v338_v48  ;;  %v1012_v58 = vpop.f32.mrb[5].mxu0 }
 0x103   : >> { %v397_v59 = vpop.f32.mrb[6].mxu0 }
 0x104   : >> { %v577_v60 = vpop.f32.mrb[8].mxu1  ;;  %v458_v61 = vadd.f32 %v452_v51, %v400_v57  ;;  %v1013_v62 = vpop.f32.mrb[7].mxu0 }
 0x105   : >> { %v1030_v63 = vpop.f32.mrb[9].mxu1 }
 0x106   : >> { %v580_v1 = vpop.f32.mrb[10].mxu1 }
 0x107   : >> { %v1031_v2 = vpop.f32.mrb[11].mxu1 }
 0x109   : >> { %v519_v3 = vpop.f32.mrb[8].mxu0 }
 0x10a   : >> { %v525_v4 = vadd.f32 %v519_v3, %v458_v61  ;;  %v1024_v5 = vpop.f32.mrb[9].mxu0 }
 0x10b   : >> { %v522_v6 = vpop.f32.mrb[10].mxu0 }
 0x10c   : >> { %v702_v7 = vpop.f32.mrb[12].mxu1  ;;  %v583_v8 = vadd.f32 %v577_v60, %v525_v4  ;;  %v1025_v9 = vpop.f32.mrb[11].mxu0 }
 0x10d   : >> { %v1042_v10 = vpop.f32.mrb[13].mxu1 }
 0x10e   : >> { %v705_v11 = vpop.f32.mrb[14].mxu1 }
 0x10f   : >> { %v1043_v12 = vpop.f32.mrb[15].mxu1 }
 0x111   : >> { %v635_v13 = vpop.f32.mrb[12].mxu0 }
 0x112   : >> { %v641_v14 = vadd.f32 %v635_v13, %v583_v8  ;;  %v1036_v15 = vpop.f32.mrb[13].mxu0 }
 0x113   : >> { %v638_v16 = vpop.f32.mrb[14].mxu0 }
 0x114   : >> { %v708_v17 = vadd.f32 %v702_v7, %v641_v14  ;;  %v1037_v18 = vpop.f32.mrb[15].mxu0 }
 0x119   : >> { %v760_v19 = vpop.f32.mrb[16].mxu0 }
 0x11a   : >> { %v766_v20 = vadd.f32 %v760_v19, %v708_v17  ;;  %v1048_v21 = vpop.f32.mrb[17].mxu0  ;;  %220 = sbr.rel (!%p218_p12) target bundleno = 27 (0x1b), region = 92 }
 0x11b   : >> { %v763_v22 = vpop.f32.mrb[18].mxu0 }
 0x11c   : >> { %v773_v23 = vadd.f32 %v1306_v0, %v766_v20  ;;  %v1049_v24 = vpop.f32.mrb[19].mxu0 }
 0x11e   : >> { %v774_v25 = vmax.f32 %v773_v23, 0.0 }
 0x120   : >> { %778 = vst.msk [vmem:[%s776_s23] sm:$0xff] %vm777_vm2, %v774_v25 }
 0x121   : > { %1146 = shalt.err (!%p1143_p6)
}
 0x122   : > { %s1147_s26 = scalar_lea.hbm %s1416_s11, 1024  ;;  %s1151_s27 = scalar_lea.hbm %s1473_s3, 2048 }
 0x123   : > { %p1148_p7 = scmp.ne.s32.totalorder %s1416_s11, %s1147_s26  ;;  %p1152_p11 = scmp.lt.u32.totalorder %s1416_s11, %s1473_s3 }
 0x124   : > { %p1153_p12 = scmp.lt.u32.totalorder %s1151_s27, %s1147_s26  ;;  %p1155_p0 = scmp.lt.u32.totalorder %s1147_s26, %s1416_s11 }
 0x125   : > { %p1149_p9 = pnand %p1148_p7, %p1286_p4 }
 0x126   : > { %p1154_p13 = por %p1153_p12, %p1152_p11 }
 0x127   : > { %p1150_p10 = pneg %p1149_p9 }
 0x128   : > { %p1156_p1 = por %p1155_p0, %p1154_p13 }
 0x12a   : > { %p1157_p2 = pnand %p1156_p1, %p1150_p10 }
 0x12c   : > { %1160 = shalt.err (!%p1157_p2)
}
 0x12d   : > { %s1224_s4 = smov 128   ;;  %s1225_s23 = smov 8  }
 0x12e   : > { %1051 = dma.vmem_to_hbm [thread:$0]  (%p1286_p4), %s1420_s21, 1024, %s1416_s11, %s1424_s9, %s1224_s4, %s1224_s4, %s1225_s23  }
 0x12f PF: > { %p1057_p3 = scmp.ge.s32.totalorder %s1215_s17, 2  ;;  %s809_s5 = sand.u32 1, %s1195_s12  }
 0x130   : > { %s810_s6 = scalar_lea.sflag [#allocation3], %s809_s5 }
 0x131   : > { %p1054_p5 = pnand %p1057_p3, %p1293_p8 }
 0x133   : > { %1190 = dma.done.wait (!%p1054_p5), %s810_s6, 1024  }
 0x134   : > { %1192 = vsyncadd (!%p1054_p5), %s810_s6, 4294966272  ;;  %s16_s17 = sadd.s32 1, %s1215_s17   ;;  %s1476_s12 = smov %s1199_s13 }
 0x135   : > { %p13_p6 = scmp.ge.s32.totalorder %s16_s17, 4   ;;  %s1477_s13 = smov %s1203_s14 }
 0x136   : > { %s1478_s14 = smov %s1299_s25  ;;  %s1479_s15 = smov %s1211_s16 }
 0x137   : > { %s1480_s16 = smov %s1482_s20  ;;  %15 = sbr.rel (!%p13_p6) target bundleno = 4 (0x4), region = 103 }
 0x13e   :  { %815 = vsyncpa [#allocation3], 1 }
 0x13f   :  { %817 = vsyncpa [#allocation3 + $0x1], 1 }

</bundles_post_ra>
